<compile_context>
chip_gen: v5e
topology: v5e:2x2
jax: 0.10.0
libtpu: 0.0.40
codegen_flags: <defaults>
</compile_context>

<pallas_src>
import jax
import jax.numpy as jnp
from jax.experimental import pallas as pl
from jax.experimental.pallas import tpu as pltpu


def _addcoords_kernel(x_ref, coords_ref, o_ref):
    # x_ref: (tN, C, tL)   coords_ref: (2, tL)   o_ref: (tN, C+2, tL)
    tN, C, tL = x_ref.shape
    # Passthrough channels (lane-dense copy).
    o_ref[:, 0:C, :] = x_ref[...]
    # Coordinate channels [yy, xx]; identical for every batch element.
    o_ref[:, C:C + 2, :] = jnp.broadcast_to(coords_ref[...], (tN, 2, tL))


def _divisors_desc(n):
    ds = set()
    d = 1
    while d * d <= n:
        if n % d == 0:
            ds.add(d)
            ds.add(n // d)
        d += 1
    return sorted(ds, reverse=True)


def _choose_tiles(N, C, L, itemsize, budget_bytes=8 * 1024 * 1024):
    """Pick (tN, tL) so double-buffered in+out+coords blocks fit the budget."""
    def footprint(tn, tl):
        # 2x for double-buffered pipelining of input, output and coords blocks.
        return 2 * (tn * (2 * C + 2) * tl + 2 * tl) * itemsize

    # Lane-dense candidates: divisors of L that are multiples of 128.
    # Fall back to full L (full-extent last dim is always a legal block).
    tl_cands = [d for d in _divisors_desc(L) if d % 128 == 0] or [L]
    tL = next((d for d in tl_cands if footprint(1, d) <= budget_bytes),
              tl_cands[-1])
    tN = next((d for d in _divisors_desc(N) if footprint(d, tL) <= budget_bytes),
              1)
    return tN, tL


def add_coords(x: jax.Array) -> jax.Array:
    """x: (N, C, H, W) float32 -> (N, C+2, H, W) float32."""
    N, C, H, W = x.shape
    L = H * W
    dtype = x.dtype

    # Free view for contiguous NCHW: flatten spatial dims (lane-dense last dim).
    xf = x.reshape(N, C, L)

    # Precompute the (2, L) coordinate plane once, fused multiply-add norm.
    # (On-device division keeps PyTorch's inf/nan behavior for H==1 / W==1.)
    scale_y = jnp.float32(2.0) / jnp.float32(H - 1)
    scale_x = jnp.float32(2.0) / jnp.float32(W - 1)
    yy = jnp.arange(H, dtype=jnp.float32) * scale_y - 1.0
    xx = jnp.arange(W, dtype=jnp.float32) * scale_x - 1.0
    coords = jnp.stack(
        [jnp.broadcast_to(yy[:, None], (H, W)).reshape(L),
         jnp.broadcast_to(xx[None, :], (H, W)).reshape(L)],
        axis=0,
    ).astype(dtype)  # (2, L): [yy, xx] matches the torch.cat channel order

    tN, tL = _choose_tiles(N, C, L, jnp.dtype(dtype).itemsize)
    grid = (N // tN, L // tL)

    out = pl.pallas_call(
        _addcoords_kernel,
        out_shape=jax.ShapeDtypeStruct((N, C + 2, L), dtype),
        grid_spec=pltpu.PrefetchScalarGridSpec(
            num_scalar_prefetch=0,
            grid=grid,
            in_specs=[
                pl.BlockSpec((tN, C, tL), lambda n, l: (n, 0, l)),
                pl.BlockSpec((2, tL), lambda n, l: (0, l)),
            ],
            out_specs=pl.BlockSpec((tN, C + 2, tL), lambda n, l: (n, 0, l)),
        ),
        compiler_params=pltpu.CompilerParams(
            dimension_semantics=("parallel", "parallel"),
            vmem_limit_bytes=32 * 1024 * 1024,
        ),
    )(xf, coords)

    return out.reshape(N, C + 2, H, W)


def _reference_add_coords(x: jnp.ndarray) -> jnp.ndarray:
    """Pure-JAX reference mirroring the PyTorch forward."""
    N, C, H, W = x.shape
    xx = jnp.arange(W, dtype=jnp.float32)
    xx = jnp.broadcast_to(xx[None, None, None, :], (N, 1, H, W))
    yy = jnp.arange(H, dtype=jnp.float32)
    yy = jnp.broadcast_to(yy[None, None, :, None], (N, 1, H, W))
    xx = (xx / (W - 1)) * 2.0 - 1.0
    yy = (yy / (H - 1)) * 2.0 - 1.0
    return jnp.concatenate([x, yy, xx], axis=1)


if __name__ == "__main__":
    key = jax.random.PRNGKey(0)
    N, C, H, W = 2, 4, 16, 16
    x = jax.random.normal(key, (N, C, H, W), dtype=jnp.float32)

    out = jax.block_until_ready(add_coords(x))

    ref = _reference_add_coords(x)
    assert out.shape == (N, C + 2, H, W), out.shape
    assert out.dtype == jnp.float32
    assert jnp.allclose(out, ref, atol=1e-6), "mismatch vs reference"

    print("KERNEL_OK")
</pallas_src>

<mosaic_0001>
module attributes {stable_mosaic.version = 11 : i64} {
  func.func @_addcoords_kernel(%arg0: i32, %arg1: i32, %arg2: memref<2x4x256xf32, #tpu.memory_space<vmem>>, %arg3: memref<2x256xf32, #tpu.memory_space<vmem>>, %arg4: memref<2x6x256xf32, #tpu.memory_space<vmem>>) attributes {dimension_semantics = [#tpu.dimension_semantics<parallel>, #tpu.dimension_semantics<parallel>], iteration_bounds = array<i64: 1, 1>, scalar_prefetch = 0 : i64, scratch_operands = 0 : i64, tpu.core_type = #tpu.core_type<tc>, window_params = [{transform_indices = @transform_0, window_bounds = array<i64: 2, 4, 256>}, {transform_indices = @transform_1, window_bounds = array<i64: 2, 256>}, {transform_indices = @transform_2, window_bounds = array<i64: 2, 6, 256>}]} {
    %c0 = arith.constant 0 : index
    %c0_0 = arith.constant 0 : index
    %c0_1 = arith.constant 0 : index
    %0 = vector.load %arg2[%c0, %c0_0, %c0_1] : memref<2x4x256xf32, #tpu.memory_space<vmem>>, vector<2x4x256xf32>
    %c0_2 = arith.constant 0 : index
    %c0_3 = arith.constant 0 : index
    %c0_4 = arith.constant 0 : index
    %1 = vector.load %arg4[%c0_2, %c0_3, %c0_4] : memref<2x6x256xf32, #tpu.memory_space<vmem>>, vector<2x4x256xf32>
    tpu.vector_store %arg4[%c0_2, %c0_3, %c0_4], %0 {strides = array<i32>} : memref<2x6x256xf32, #tpu.memory_space<vmem>>, vector<2x4x256xf32>,
    %c0_5 = arith.constant 0 : index
    %c0_6 = arith.constant 0 : index
    %2 = vector.load %arg3[%c0_5, %c0_6] : memref<2x256xf32, #tpu.memory_space<vmem>>, vector<2x256xf32>
    %3 = vector.shape_cast %2 : vector<2x256xf32> to vector<1x2x256xf32>
    %4 = vector.broadcast %3 : vector<1x2x256xf32> to vector<2x2x256xf32>
    %c0_7 = arith.constant 0 : index
    %c4 = arith.constant 4 : index
    %c0_8 = arith.constant 0 : index
    %5 = vector.load %arg4[%c0_7, %c4, %c0_8] : memref<2x6x256xf32, #tpu.memory_space<vmem>>, vector<2x2x256xf32>
    tpu.vector_store %arg4[%c0_7, %c4, %c0_8], %4 {strides = array<i32>} : memref<2x6x256xf32, #tpu.memory_space<vmem>>, vector<2x2x256xf32>,
    return
  }
  func.func @transform_0(%arg0: i32, %arg1: i32) -> (i32, i32, i32) {
    %c0_i32 = arith.constant 0 : i32
    %c0_i32_0 = arith.constant 0 : i32
    return %arg0, %c0_i32, %arg1 : i32, i32, i32
  }
  func.func @transform_1(%arg0: i32, %arg1: i32) -> (i32, i32) {
    %c0_i32 = arith.constant 0 : i32
    %c0_i32_0 = arith.constant 0 : i32
    return %c0_i32, %arg1 : i32, i32
  }
  func.func @transform_2(%arg0: i32, %arg1: i32) -> (i32, i32, i32) {
    %c0_i32 = arith.constant 0 : i32
    %c0_i32_0 = arith.constant 0 : i32
    return %arg0, %c0_i32, %arg1 : i32, i32, i32
  }
}

</mosaic_0001>

<bundles_post_ra>
// kernel: tpu_custom_call.1
= control target key start
LH: loop header
LB: loop body
LE: loop exit
PB: predicated region body
PF: predicated region fallthrough
CT: control target
= control target key end

     0   :  { %7 = vsyncpa [#allocation3], 0  ;;  %s189_s0 = inlined_call_operand.hbm [shape: f32[2,4,256], index: 0, kind: input, shape index: {}]   ;;  %s190_s1 = inlined_call_operand.hbm [shape: f32[2,256], index: 1, kind: input, shape index: {}]   ;;  %s191_s2 = inlined_call_operand.vmem [shape: f32[2,6,256], index: 2, kind: output, shape index: {}]  }
   0x1   :  { %s13_s11 = sshll.u32 %s189_s0, 4  ;;  %s14_s11 = int_to_ptr.hbm [resolvable:$true] %s13_s11 }
   0x2   :  { %8 = vsyncpa [#allocation5], 0  ;;  %s140_s12 = smov [#allocation2]   ;;  %s27_s16 = sshll.u32 %s190_s1, 4  ;;  %s28_s16 = int_to_ptr.hbm [resolvable:$true] %s27_s16 }
   0x3   :  { %s15_s13 = sshll.u32 %s140_s12, 4  ;;  %s141_s17 = smov 128   ;;  %s16_s13 = int_to_ptr.vmem [resolvable:$true] %s15_s13 }
   0x4   :  { %s142_s18 = smov 8   ;;  %s143_s19 = smov [#allocation4]  }
   0x5   :  { %21 = dma.hbm_to_vmem [thread:$0]  %s14_s11, 256, %s16_s13, [#allocation3], %s141_s17, %s141_s17, %s142_s18  }
   0x6   :  { %s29_s20 = sshll.u32 %s143_s19, 4  ;;  %s30_s20 = int_to_ptr.vmem [resolvable:$true] %s29_s20 }
   0x7   :  { %32 = dma.hbm_to_vmem [thread:$0]  %s28_s16, 64, %s30_s20, [#allocation5]  }
   0x8   :  { %136 = dma.done.wait [#allocation3], 256  }
   0x9   :  { %137 = vsyncadd [#allocation3], 4294967040 }
   0xa   :  { %138 = dma.done.wait [#allocation5], 64  }
   0xb   :  { %139 = vsyncadd [#allocation5], 4294967232  ;;  %v41_v0 = vld [vmem:[#allocation2] sm:$0xff]  ;;  %v42_v1 = vld [vmem:[#allocation2 + $0x8] sm:$0xff] }
   0xc   :  { %v60_v2 = vld [vmem:[#allocation4] sm:$0xf]  ;;  %45 = vst [vmem:[#allocation1] ss:$2 sm:$0xff] %v41_v0 }
   0xd   :  { %49 = vst [vmem:[#allocation1 + $0x10] ss:$2 sm:$0xff] %v42_v1 }
   0xe   :  { %67 = vst [vmem:[#allocation1 + $0x22] ss:$4 sm:$0xff] %v60_v2 }
  0x13   :  { %v46_v3 = vld.sshfl [vmem:[#allocation1] sm:$0xff pattern:$0x75316420]  ;;  %v47_v4 = vld.sshfl [vmem:[#allocation1 + $0x8] sm:$0xff pattern:$0x75316420] }
  0x14   :  { %56 = vst [vmem:[%s191_s2] sm:$0xf] %v46_v3  ;;  %v50_v5 = vld.sshfl [vmem:[#allocation1 + $0x10] sm:$0xff pattern:$0x75316420] }
  0x15   :  { %57 = vst [vmem:[%s191_s2 + $0x8] sm:$0xf] %v47_v4  ;;  %v51_v6 = vld.sshfl [vmem:[#allocation1 + $0x18] sm:$0xff pattern:$0x75316420] }
  0x16   :  { %58 = vst [vmem:[%s191_s2 + $0x10] sm:$0xf] %v50_v5  ;;  %v68_v7 = vld.sshfl [vmem:[#allocation1 + $0x20] sm:$0xff pattern:$0x73625140] }
  0x17   :  { %59 = vst [vmem:[%s191_s2 + $0x18] sm:$0xf] %v51_v6  ;;  %v69_v8 = vld.sshfl [vmem:[#allocation1 + $0x28] sm:$0xff pattern:$0x73625140] }
  0x18   :  { %63 = vst [vmem:[#allocation1 + $0x2] ss:$4 sm:$0xff] %v60_v2 }
  0x19   :  { %76 = vst [vmem:[%s191_s2 + $0x10] sm:$0x30] %v68_v7 }
  0x1a   :  { %77 = vst [vmem:[%s191_s2 + $0x18] sm:$0x30] %v69_v8 }
  0x1f   :  { %v64_v9 = vld.sshfl [vmem:[#allocation1] sm:$0xff pattern:$0x73625140]  ;;  %v65_v10 = vld.sshfl [vmem:[#allocation1 + $0x8] sm:$0xff pattern:$0x73625140] }
  0x20   :  { %74 = vst [vmem:[%s191_s2] sm:$0x30] %v64_v9 }
  0x21   :  { %75 = vst [vmem:[%s191_s2 + $0x8] sm:$0x30] %v65_v10 }
  0x22   :  { %82 = vsyncpa [#allocation3], 1 }
  0x23   :  { %83 = vsyncpa [#allocation5], 1 }

</bundles_post_ra>
